<compile_context>
chip_gen: v7x
topology: tpu7x:2x2x1
jax: 0.10.0
libtpu: 0.0.40
codegen_flags: <defaults>
</compile_context>

<pallas_src>
import functools
import math

import jax
import jax.numpy as jnp
from jax.experimental import pallas as pl
from jax.experimental.pallas import tpu as pltpu

HIDDEN_SIZE = 4

LANE_WIDTH = 1024      # lane-dense last dim (multiple of 128 -> unmasked vst)
MAX_TILE_ROWS = 1024   # 1024 x 1024 f32 tile = 4 MiB per buffer


def _round_up(x, m):
    return ((x + m - 1) // m) * m


def _cdiv(a, b):
    return -(-a // b)


def _choose_tiling(rows):
    """Pick (tile_rows, num_tiles) for the row axis.

    - Big inputs: ~MAX_TILE_ROWS tiles, balanced, multiple of 8 rows.
    - Medium inputs (>=16 rows): force at least 2 tiles so both v7x
      TensorCores get work under dimension_semantics=("parallel",).
    - Tiny inputs: one block equal to the full array (exempt from the 8-row
      rule because the block equals the array dim).
    """
    n_tiles = max(1, _cdiv(rows, MAX_TILE_ROWS))
    if n_tiles == 1 and rows >= 16:
        n_tiles = 2
    if n_tiles == 1:
        return rows, 1
    tile_rows = _round_up(_cdiv(rows, n_tiles), 8)
    return tile_rows, _cdiv(rows, tile_rows)


def elm_kernel(c1_ref, cb_ref, c2_ref, cbias_ref, x_ref, o_ref, *, hidden_size):
    """Fused ELM forward on one [tile_rows, lane] tile.

    c1_ref   : [H]  SMEM, 0.5 * input_layer.weight[:, 0]
    cb_ref   : [H]  SMEM, 0.5 * input_layer.bias
    c2_ref   : [H]  SMEM, 0.5 * output_layer.weight[0, :]
    cbias_ref: [1]  SMEM, 0.5 * sum(output_layer.weight)
    x_ref    : [tile_rows, lane] VMEM, native input dtype
    o_ref    : [tile_rows, lane] VMEM, native output dtype
    """
    # Read the tiny SMEM scalar tables once per tile.
    c1 = [c1_ref[j] for j in range(hidden_size)]
    cb = [cb_ref[j] for j in range(hidden_size)]
    c2 = [c2_ref[j] for j in range(hidden_size)]

    x = x_ref[...].astype(jnp.float32)   # compute in f32, I/O in native dtype

    # One affine + one EUP tanh + one scale per hidden unit (H is tiny -> the
    # Python loop is a statically unrolled sequence of VPU/EUP ops).
    terms = [c2[j] * jnp.tanh(c1[j] * x + cb[j]) for j in range(hidden_size)]

    # Pairwise tree sum: shorter serial add chain than a running accumulator,
    # and no full-tile broadcast for the init.
    while len(terms) > 1:
        nxt = [terms[i] + terms[i + 1] for i in range(0, len(terms) - 1, 2)]
        if len(terms) % 2:
            nxt.append(terms[-1])
        terms = nxt

    o_ref[...] = (terms[0] + cbias_ref[0]).astype(o_ref.dtype)


@jax.jit
def elm_forward(x, w1, b1, w2):
    """x: [..., 1] -> [..., 1] (ELM forward).  Compute in f32, I/O in x.dtype."""
    orig_shape = x.shape
    assert orig_shape[-1] == 1, "last dim must be the size-1 feature dim"
    n = int(math.prod(orig_shape[:-1]))
    hidden = int(w1.shape[0])
    out_dtype = x.dtype

    # ---- lane-dense [rows, lane] slab in the native dtype -------------------
    # Full 1024-wide lanes for big inputs; for tiny inputs just enough
    # multiples of 128 so there is little or (usually) no tail padding.
    lane = LANE_WIDTH if n >= LANE_WIDTH else _round_up(max(n, 1), 128)
    rows = _cdiv(n, lane)
    padded = rows * lane

    xf = x.reshape(-1)                        # no dtype cast (native-dtype DMA)
    if padded != n:
        xf = jnp.pad(xf, (0, padded - n))     # < lane elements of tail pad
    x2d = xf.reshape(rows, lane)

    tile_rows, num_tiles = _choose_tiling(rows)

    # ---- fold the sigmoid->tanh rewrite constants on the host side ----------
    c1 = (0.5 * w1).astype(jnp.float32).reshape(hidden)
    cb = (0.5 * b1).astype(jnp.float32).reshape(hidden)
    c2 = (0.5 * w2).astype(jnp.float32).reshape(hidden)
    cbias = (0.5 * jnp.sum(w2)).astype(jnp.float32).reshape(1)

    cost = pl.CostEstimate(
        flops=(4 * hidden + 1) * n,
        transcendentals=hidden * n,
        bytes_accessed=2 * n * x.dtype.itemsize,
    )

    out2d = pl.pallas_call(
        functools.partial(elm_kernel, hidden_size=hidden),
        out_shape=jax.ShapeDtypeStruct((rows, lane), out_dtype),
        grid_spec=pltpu.PrefetchScalarGridSpec(
            num_scalar_prefetch=0,
            grid=(num_tiles,),
            in_specs=[
                pl.BlockSpec(memory_space=pltpu.MemorySpace.SMEM),  # c1
                pl.BlockSpec(memory_space=pltpu.MemorySpace.SMEM),  # cb
                pl.BlockSpec(memory_space=pltpu.MemorySpace.SMEM),  # c2
                pl.BlockSpec(memory_space=pltpu.MemorySpace.SMEM),  # cbias
                pl.BlockSpec((tile_rows, lane), lambda i: (i, 0)),  # x
            ],
            out_specs=pl.BlockSpec((tile_rows, lane), lambda i: (i, 0)),
        ),
        compiler_params=pltpu.CompilerParams(
            dimension_semantics=("parallel",),   # shard tiles across TCs (v7x)
            vmem_limit_bytes=48 << 20,           # 2x(in+out) 4 MiB tiles + temps
        ),
        cost_estimate=cost,
    )(c1, cb, c2, cbias, x2d)

    out = out2d.reshape(-1)
    if padded != n:
        out = out[:n]
    return out.reshape(orig_shape)


def elm_reference(x, w1, b1, w2):
    """Plain-JAX reference mirroring the PyTorch module (sigmoid form)."""
    h = jax.nn.sigmoid(x * w1 + b1)                    # [..., H]
    return jnp.sum(h * w2, axis=-1, keepdims=True)     # [..., 1]


if __name__ == "__main__":
    key = jax.random.PRNGKey(0)
    k_x, k_w1, k_b1, k_w2 = jax.random.split(key, 4)

    B, S, H = 2, 128, HIDDEN_SIZE

    # Deterministic synthetic parameters (shapes from the module __init__):
    #   input_layer.weight ~ Normal(0, 0.1), shape [H, 1] -> stored squeezed [H]
    #   input_layer.bias   ~ Uniform(-1, 1)  (PyTorch Linear default, fan_in=1)
    #   output_layer.weight ~ Uniform(-1/sqrt(H), 1/sqrt(H)), shape [1, H] -> [H]
    w1 = (0.1 * jax.random.normal(k_w1, (H,))).astype(jnp.float32)
    b1 = jax.random.uniform(k_b1, (H,), minval=-1.0, maxval=1.0).astype(jnp.float32)
    bound = 1.0 / float(jnp.sqrt(jnp.float32(H)))
    w2 = jax.random.uniform(k_w2, (H,), minval=-bound, maxval=bound).astype(jnp.float32)

    x = jax.random.normal(k_x, (B, S, 1), dtype=jnp.float32)

    out = elm_forward(x, w1, b1, w2)
    out = jax.block_until_ready(out)

    ref = elm_reference(x, w1, b1, w2)
    assert out.shape == (B, S, 1)
    assert jnp.allclose(out, ref, atol=1e-5, rtol=1e-5), "mismatch vs reference"

    print("KERNEL_OK")
</pallas_src>

<mosaic_0001>
module attributes {stable_mosaic.version = 11 : i64} {
  func.func @elm_kernel(%arg0: i32, %arg1: memref<4xf32, #tpu.memory_space<smem>>, %arg2: memref<4xf32, #tpu.memory_space<smem>>, %arg3: memref<4xf32, #tpu.memory_space<smem>>, %arg4: memref<1xf32, #tpu.memory_space<smem>>, %arg5: memref<1x256xf32, #tpu.memory_space<vmem>>, %arg6: memref<1x256xf32, #tpu.memory_space<vmem>>) attributes {dimension_semantics = [#tpu.dimension_semantics<parallel>], iteration_bounds = array<i64: 1>, scalar_prefetch = 0 : i64, scratch_operands = 0 : i64, tpu.core_type = #tpu.core_type<tc>, window_params = [{transform_indices = @transform_0, window_bounds = array<i64: 4>}, {transform_indices = @transform_1, window_bounds = array<i64: 4>}, {transform_indices = @transform_2, window_bounds = array<i64: 4>}, {transform_indices = @transform_3, window_bounds = array<i64: 1>}, {transform_indices = @transform_4, window_bounds = array<i64: 1, 256>}, {transform_indices = @transform_5, window_bounds = array<i64: 1, 256>}]} {
    %c0 = arith.constant 0 : index
    %0 = memref.load %arg1[%c0] : memref<4xf32, #tpu.memory_space<smem>>
    %c1 = arith.constant 1 : index
    %1 = memref.load %arg1[%c1] : memref<4xf32, #tpu.memory_space<smem>>
    %c2 = arith.constant 2 : index
    %2 = memref.load %arg1[%c2] : memref<4xf32, #tpu.memory_space<smem>>
    %c3 = arith.constant 3 : index
    %3 = memref.load %arg1[%c3] : memref<4xf32, #tpu.memory_space<smem>>
    %c0_0 = arith.constant 0 : index
    %4 = memref.load %arg2[%c0_0] : memref<4xf32, #tpu.memory_space<smem>>
    %c1_1 = arith.constant 1 : index
    %5 = memref.load %arg2[%c1_1] : memref<4xf32, #tpu.memory_space<smem>>
    %c2_2 = arith.constant 2 : index
    %6 = memref.load %arg2[%c2_2] : memref<4xf32, #tpu.memory_space<smem>>
    %c3_3 = arith.constant 3 : index
    %7 = memref.load %arg2[%c3_3] : memref<4xf32, #tpu.memory_space<smem>>
    %c0_4 = arith.constant 0 : index
    %8 = memref.load %arg3[%c0_4] : memref<4xf32, #tpu.memory_space<smem>>
    %c1_5 = arith.constant 1 : index
    %9 = memref.load %arg3[%c1_5] : memref<4xf32, #tpu.memory_space<smem>>
    %c2_6 = arith.constant 2 : index
    %10 = memref.load %arg3[%c2_6] : memref<4xf32, #tpu.memory_space<smem>>
    %c3_7 = arith.constant 3 : index
    %11 = memref.load %arg3[%c3_7] : memref<4xf32, #tpu.memory_space<smem>>
    %c0_8 = arith.constant 0 : index
    %c0_9 = arith.constant 0 : index
    %12 = vector.load %arg5[%c0_8, %c0_9] : memref<1x256xf32, #tpu.memory_space<vmem>>, vector<1x256xf32>
    %13 = vector.broadcast %0 : f32 to vector<1x256xf32>
    %14 = arith.mulf %13, %12 : vector<1x256xf32>
    %15 = vector.broadcast %4 : f32 to vector<1x256xf32>
    %16 = arith.addf %14, %15 : vector<1x256xf32>
    %17 = math.tanh %16 : vector<1x256xf32>
    %18 = vector.broadcast %8 : f32 to vector<1x256xf32>
    %19 = arith.mulf %18, %17 : vector<1x256xf32>
    %20 = vector.broadcast %1 : f32 to vector<1x256xf32>
    %21 = arith.mulf %20, %12 : vector<1x256xf32>
    %22 = vector.broadcast %5 : f32 to vector<1x256xf32>
    %23 = arith.addf %21, %22 : vector<1x256xf32>
    %24 = math.tanh %23 : vector<1x256xf32>
    %25 = vector.broadcast %9 : f32 to vector<1x256xf32>
    %26 = arith.mulf %25, %24 : vector<1x256xf32>
    %27 = vector.broadcast %2 : f32 to vector<1x256xf32>
    %28 = arith.mulf %27, %12 : vector<1x256xf32>
    %29 = vector.broadcast %6 : f32 to vector<1x256xf32>
    %30 = arith.addf %28, %29 : vector<1x256xf32>
    %31 = math.tanh %30 : vector<1x256xf32>
    %32 = vector.broadcast %10 : f32 to vector<1x256xf32>
    %33 = arith.mulf %32, %31 : vector<1x256xf32>
    %34 = vector.broadcast %3 : f32 to vector<1x256xf32>
    %35 = arith.mulf %34, %12 : vector<1x256xf32>
    %36 = vector.broadcast %7 : f32 to vector<1x256xf32>
    %37 = arith.addf %35, %36 : vector<1x256xf32>
    %38 = math.tanh %37 : vector<1x256xf32>
    %39 = vector.broadcast %11 : f32 to vector<1x256xf32>
    %40 = arith.mulf %39, %38 : vector<1x256xf32>
    %41 = arith.addf %19, %26 : vector<1x256xf32>
    %42 = arith.addf %33, %40 : vector<1x256xf32>
    %43 = arith.addf %41, %42 : vector<1x256xf32>
    %c0_10 = arith.constant 0 : index
    %44 = memref.load %arg4[%c0_10] : memref<1xf32, #tpu.memory_space<smem>>
    %45 = vector.broadcast %44 : f32 to vector<1x256xf32>
    %46 = arith.addf %43, %45 : vector<1x256xf32>
    %c0_11 = arith.constant 0 : index
    %c0_12 = arith.constant 0 : index
    %47 = vector.load %arg6[%c0_11, %c0_12] : memref<1x256xf32, #tpu.memory_space<vmem>>, vector<1x256xf32>
    tpu.vector_store %arg6[%c0_11, %c0_12], %46 {strides = array<i32>} : memref<1x256xf32, #tpu.memory_space<vmem>>, vector<1x256xf32>,
    return
  }
  func.func @transform_0(%arg0: i32) -> i32 {
    %c0_i32 = arith.constant 0 : i32
    %c0_i32_0 = arith.constant 0 : i32
    return %c0_i32 : i32
  }
  func.func @transform_1(%arg0: i32) -> i32 {
    %c0_i32 = arith.constant 0 : i32
    %c0_i32_0 = arith.constant 0 : i32
    return %c0_i32 : i32
  }
  func.func @transform_2(%arg0: i32) -> i32 {
    %c0_i32 = arith.constant 0 : i32
    %c0_i32_0 = arith.constant 0 : i32
    return %c0_i32 : i32
  }
  func.func @transform_3(%arg0: i32) -> i32 {
    %c0_i32 = arith.constant 0 : i32
    %c0_i32_0 = arith.constant 0 : i32
    return %c0_i32 : i32
  }
  func.func @transform_4(%arg0: i32) -> (i32, i32) {
    %c0_i32 = arith.constant 0 : i32
    %c0_i32_0 = arith.constant 0 : i32
    return %arg0, %c0_i32 : i32, i32
  }
  func.func @transform_5(%arg0: i32) -> (i32, i32) {
    %c0_i32 = arith.constant 0 : i32
    %c0_i32_0 = arith.constant 0 : i32
    return %arg0, %c0_i32 : i32, i32
  }
}

</mosaic_0001>

<bundles_post_ra>
// kernel: elm_forward.1
= control target key start
LH: loop header
LB: loop body
LE: loop exit
PB: predicated region body
PF: predicated region fallthrough
CT: control target
= control target key end

     0   :  { %11 = vsyncpa [#allocation5], 0  ;;  %s272_s0 = inlined_call_operand.vmem [shape: f32[4], index: 0, kind: input, shape index: {}]   ;;  %s273_s1 = inlined_call_operand.vmem [shape: f32[4], index: 1, kind: input, shape index: {}]   ;;  %s274_s2 = inlined_call_operand.vmem [shape: f32[4], index: 2, kind: input, shape index: {}]   ;;  %s275_s3 = inlined_call_operand.<no memory space> [shape: f32[1], index: 3, kind: input, shape index: {}]   ;;  %s276_s4 = inlined_call_operand.vmem [shape: f32[1,256], index: 4, kind: input, shape index: {}]   ;;  %s277_s5 = inlined_call_operand.hbm [shape: f32[1,256], index: 5, kind: output, shape index: {}]  }
   0x1   :  { %12 = vsyncpa [#allocation7], 0  ;;  %s30_s20 = sshll.u32 %s273_s1, 4  ;;  %s31_s20 = int_to_ptr.vmem [resolvable:$true] %s30_s20 }
   0x2   :  { %13 = vsyncpa [#allocation4], 0  ;;  %s20_s23 = sshll.u32 %s272_s0, 4  ;;  %s147_s24 = scalar_lea.vmem %s31_s20, 16  ;;  %s21_s23 = int_to_ptr.vmem [resolvable:$true] %s20_s23 }
   0x3   :  { %p148_p0 = scmp.ne.s32.totalorder %s31_s20, %s147_s24  ;;  %p152_p1 = scmp.lt.s32.totalorder %s31_s20, %s31_s20 }
   0x4   :  { %p153_p2 = scmp.lt.s32.totalorder %s147_s24, %s147_s24 }
   0x6   :  { %p154_p3 = por %p153_p2, %p152_p1 }
   0x8   :  { %p155_p4 = pnand %p154_p3, %p148_p0 }
   0xa   :  { %158 = shalt.err (!%p155_p4)
}
   0xb   :  { %s211_s25 = smov [#allocation6]   ;;  %s159_s26 = scalar_lea.vmem %s21_s23, 16 }
   0xc   :  { %33 = dma.vmem_to_smem %s31_s20, 16, %s211_s25, [#allocation7]  }
   0xd   :  { %p160_p5 = scmp.ne.s32.totalorder %s21_s23, %s159_s26  ;;  %p164_p6 = scmp.lt.s32.totalorder %s21_s23, %s21_s23 }
   0xe   :  { %p165_p7 = scmp.lt.s32.totalorder %s159_s26, %s159_s26 }
  0x10   :  { %p166_p8 = por %p165_p7, %p164_p6 }
  0x12   :  { %p167_p9 = pnand %p166_p8, %p160_p5 }
  0x14   :  { %170 = shalt.err (!%p167_p9)
}
  0x15   :  { %s212_s1 = smov [#allocation3]   ;;  %s40_s28 = sshll.u32 %s274_s2, 4  ;;  %s41_s28 = int_to_ptr.vmem [resolvable:$true] %s40_s28 }
  0x16   :  { %23 = dma.vmem_to_smem %s21_s23, 16, %s212_s1, [#allocation5]  }
  0x17   :  { %s171_s29 = scalar_lea.vmem %s41_s28, 16  ;;  %p176_p11 = scmp.lt.s32.totalorder %s41_s28, %s41_s28 }
  0x18   :  { %p172_p10 = scmp.ne.s32.totalorder %s41_s28, %s171_s29  ;;  %p177_p12 = scmp.lt.s32.totalorder %s171_s29, %s171_s29 }
  0x1a   :  { %p178_p13 = por %p177_p12, %p176_p11 }
  0x1c   :  { %p179_p0 = pnand %p178_p13, %p172_p10 }
  0x1e   :  { %182 = shalt.err (!%p179_p0)
}
  0x1f   :  { %s213_s30 = smov [#allocation8]  }
  0x20   :  { %43 = dma.vmem_to_smem %s41_s28, 16, %s213_s30, [#allocation7]  }
  0x21   :  { %205 = dma.done.wait [#allocation5], 16  }
  0x22   :  { %206 = vsyncadd [#allocation5], 4294967280 }
  0x23   :  { %207 = dma.done.wait [#allocation7], 32  }
  0x24   :  { %208 = vsyncadd [#allocation7], 4294967264 }
  0x25   :  { %57 = sfence }
  0x26   :  { %s58_s6 = sld [smem:[#allocation3]]  ;;  %s126_s7 = sld [smem:[#allocation3 + $0x1]]  ;;  %v70_v0 = vld [vmem:[%s276_s4] sm:$0x3]  ;;  %v105_v30 = vlaneseq  ;;  %v103_v32 = vstv %s275_s3 }
  0x27   :  { %s127_s8 = sld [smem:[#allocation3 + $0x2]]  ;;  %s128_s9 = sld [smem:[#allocation3 + $0x3]] }
  0x28   :  { %s62_s2 = sld [smem:[#allocation6]]  ;;  %s129_s10 = sld [smem:[#allocation6 + $0x1]]  ;;  %vm107_vm0 = vcmp.lt.s32.totalorder %v105_v30, 256 }
  0x29   :  { %s130_s11 = sld [smem:[#allocation6 + $0x2]]  ;;  %s131_s12 = sld [smem:[#allocation6 + $0x3]] }
  0x2a   :  { %s66_s15 = sld [smem:[#allocation8]]  ;;  %s132_s16 = sld [smem:[#allocation8 + $0x1]] }
  0x2b   :  { %s133_s4 = sld [smem:[#allocation8 + $0x2]]  ;;  %s134_s17 = sld [smem:[#allocation8 + $0x3]] }
  0x2c   :  { %v71_v1 = vstv %s58_s6  ;;  %v78_v2 = vstv %s126_s7  ;;  %s214_s20 = smov [#allocation9]  }
  0x2d   :  { %v72_v3 = vmul.f32 %v71_v1, %v70_v0  ;;  %v79_v4 = vmul.f32 %v78_v2, %v70_v0  ;;  %v85_v5 = vstv %s127_s8  ;;  %v92_v6 = vstv %s128_s9  ;;  %s116_s21 = sshll.u32 %s214_s20, 4  ;;  %s117_s21 = int_to_ptr.vmem [resolvable:$true] %s116_s21 }
  0x2e   :  { %v73_v7 = vstv %s62_s2  ;;  %v80_v8 = vstv %s129_s10  ;;  %v86_v9 = vmul.f32 %v85_v5, %v70_v0  ;;  %v93_v10 = vmul.f32 %v92_v6, %v70_v0  ;;  %s183_s22 = scalar_lea.vmem %s117_s21, 32  ;;  %p188_p2 = scmp.lt.s32.totalorder %s117_s21, %s117_s21 }
  0x2f   :  { %v74_v11 = vadd.f32 %v73_v7, %v72_v3  ;;  %v81_v12 = vadd.f32 %v80_v8, %v79_v4  ;;  %v87_v13 = vstv %s130_s11  ;;  %v94_v14 = vstv %s131_s12  ;;  %p184_p1 = scmp.ne.s32.totalorder %s117_s21, %s183_s22  ;;  %p189_p3 = scmp.lt.s32.totalorder %s183_s22, %s183_s22 }
  0x30   :  { %v88_v15 = vadd.f32 %v87_v13, %v86_v9  ;;  %v95_v16 = vadd.f32 %v94_v14, %v93_v10  ;;  %v76_v17 = vstv %s66_s15  ;;  %v83_v18 = vstv %s132_s16 }
  0x31   :  { %139 = vtanh.f32 %v74_v11  ;;  %v90_v20 = vstv %s133_s4  ;;  %v97_v23 = vstv %s134_s17  ;;  %p190_p4 = por %p189_p3, %p188_p2 }
  0x32   :  { %141 = vtanh.f32 %v81_v12 }
  0x33   :  { %143 = vtanh.f32 %v88_v15  ;;  %p191_p5 = pnand %p190_p4, %p184_p1 }
  0x34   :  { %145 = vtanh.f32 %v95_v16 }
  0x3b   :  { %v140_v19 = vpop.eup %139 }
  0x3c   :  { %v142_v21 = vpop.eup %141  ;;  %v77_v22 = vmul.f32 %v140_v19, %v76_v17 }
  0x3d   :  { %v144_v24 = vpop.eup %143  ;;  %v84_v25 = vmul.f32 %v142_v21, %v83_v18 }
  0x3e   :  { %v146_v26 = vpop.eup %145  ;;  %v91_v27 = vmul.f32 %v144_v24, %v90_v20 }
  0x3f   :  { %v98_v28 = vmul.f32 %v146_v26, %v97_v23  ;;  %v99_v29 = vadd.f32 %v84_v25, %v77_v22 }
  0x41   :  { %v100_v31 = vadd.f32 %v98_v28, %v91_v27 }
  0x43   :  { %v101_v33 = vadd.f32 %v100_v31, %v99_v29 }
  0x45   :  { %v104_v34 = vadd.f32 %v103_v32, %v101_v33 }
  0x47   :  { %109 = vst.msk [vmem:[#allocation9] sm:$0x3] %vm107_vm0, %v104_v34 }
  0x48   :  { %194 = shalt.err (!%p191_p5)
}
  0x49   :  { %s195_s25 = scalar_lea.hbm %s277_s5, 32 }
  0x4a   :  { %p196_p6 = scmp.ne.s32.totalorder %s277_s5, %s195_s25  ;;  %p199_p7 = scmp.lt.u32.totalorder %s195_s25, %s277_s5 }
  0x4c   :  { %p201_p8 = pnand %p199_p7, %p196_p6 }
  0x4e   :  { %204 = shalt.err (!%p201_p8)
}
  0x4f   :  { %119 = dma.vmem_to_hbm [thread:$0]  %s117_s21, 32, %s277_s5, [#allocation4]  }
  0x50   :  { %209 = dma.done.wait [#allocation4], 32  }
  0x51   :  { %210 = vsyncadd [#allocation4], 4294967264 }
  0x52   :  { %123 = vsyncpa [#allocation4], 1 }
  0x53   :  { %124 = vsyncpa [#allocation5], 1 }
  0x54   :  { %125 = vsyncpa [#allocation7], 1 }

</bundles_post_ra>
